<compile_context>
chip_gen: v7x
topology: tpu7x:2x2x1
jax: 0.10.0
libtpu: 0.0.40
codegen_flags: <defaults>
</compile_context>

<pallas_src>
import functools
import math

import jax
import jax.numpy as jnp
from jax.experimental import pallas as pl
from jax.experimental.pallas import tpu as pltpu


# ---------------------------------------------------------------------------
# In-kernel helpers
# ---------------------------------------------------------------------------
def _layernorm(v, g, b, eps=1e-5):
    mu = jnp.mean(v, axis=-1, keepdims=True)
    var = jnp.mean((v - mu) ** 2, axis=-1, keepdims=True)
    return (v - mu) * jax.lax.rsqrt(var + eps) * g + b


# ---------------------------------------------------------------------------
# Whole TransformerDist stack in one kernel.
# Grid = (batch, depth); the residual stream stays resident in VMEM scratch
# across the depth axis, weights are indexed per layer via index_map.
# ---------------------------------------------------------------------------
def transformer_kernel(heads,
                       x_ref, idx_ref,
                       ln1_g, ln1_b, wq, bq, wk, bk, wv, bv, wo, bo,
                       emb_k, emb_v, ln2_g, ln2_b, w1, b1, w2, b2,
                       norm_g, norm_b,
                       o_ref, x_scratch):
    lyr = pl.program_id(1)
    n_layers = pl.num_programs(1)

    @pl.when(lyr == 0)
    def _init():
        x_scratch[...] = x_ref[0].astype(jnp.float32)

    x = x_scratch[...]                       # (N, D) f32, resident across layers
    N, D = x.shape
    H = heads
    dk = D // H
    K1 = emb_k.shape[1]                      # number of distance buckets (k + 1)
    scale = 1.0 / math.sqrt(dk)

    idx = idx_ref[0]                         # (N, N) int32 relation indices

    # ---------------- relation-aware MHSA (pre-norm) ----------------
    h1 = _layernorm(x, ln1_g[0], ln1_b[0])
    hb = h1.astype(jnp.bfloat16)
    q = jnp.dot(hb, wq[0], preferred_element_type=jnp.float32) + bq[0]
    k = jnp.dot(hb, wk[0], preferred_element_type=jnp.float32) + bk[0]
    v = jnp.dot(hb, wv[0], preferred_element_type=jnp.float32) + bv[0]
    q = q * scale                            # fold 1/sqrt(dk) into q (both terms)

    # head-major (H, N, dk) via static lane slices + stack (no 3-D transpose)
    qh = jnp.stack([q[:, h * dk:(h + 1) * dk] for h in range(H)], axis=0)
    kh = jnp.stack([k[:, h * dk:(h + 1) * dk] for h in range(H)], axis=0)
    vh = jnp.stack([v[:, h * dk:(h + 1) * dk] for h in range(H)], axis=0)
    qh = qh.astype(jnp.bfloat16)
    kh = kh.astype(jnp.bfloat16)
    vh = vh.astype(jnp.bfloat16)

    # batched-over-heads QK^T on the MXU
    scores = jnp.einsum('hid,hjd->hij', qh, kh,
                        preferred_element_type=jnp.float32)      # (H, N, N) f32

    # Shaw bucket relation bias: qe[h,i,r] = q_h[i] . emb_k[r]   (MXU matmul),
    # bias[h,i,j] = qe[h,i,idx[i,j]] via per-bucket masked accumulation.
    ek = emb_k[0]                                                 # (K1, dk) bf16
    qe = jax.lax.dot_general(qh.reshape(H * N, dk), ek,
                             (((1,), (1,)), ((), ())),
                             preferred_element_type=jnp.float32).reshape(H, N, K1)
    masks = [(idx == r).astype(jnp.float32) for r in range(K1)]   # (N, N) each
    bias = jnp.zeros((H, N, N), jnp.float32)
    for r in range(K1):
        bias = bias + qe[:, :, r][:, :, None] * masks[r][None, :, :]
    scores = scores + bias

    # stable softmax; reciprocal of the denominator on the EUP
    scores = scores - jnp.max(scores, axis=-1, keepdims=True)
    p = jnp.exp(scores)
    p = p * pl.reciprocal(jnp.sum(p, axis=-1, keepdims=True), approx=True)

    # batched P @ V on the MXU
    ctx = jnp.einsum('hij,hjd->hid', p.astype(jnp.bfloat16), vh,
                     preferred_element_type=jnp.float32)          # (H, N, dk)

    # relation-value term: bucketed probability sums, then p_bucket @ emb_v (MXU)
    p_bucket = jnp.stack([jnp.sum(p * m[None, :, :], axis=-1) for m in masks],
                         axis=-1)                                 # (H, N, K1)
    ev = emb_v[0]                                                 # (K1, dk) bf16
    rel_ctx = jax.lax.dot_general(
        p_bucket.reshape(H * N, K1).astype(jnp.bfloat16), ev,
        (((1,), (0,)), ((), ())),
        preferred_element_type=jnp.float32).reshape(H, N, dk)
    ctx = ctx + rel_ctx

    # concat heads back to (N, D) and ONE full-width output projection
    attn = jnp.concatenate([ctx[h] for h in range(H)], axis=1)    # (N, D)
    x = x + jnp.dot(attn.astype(jnp.bfloat16), wo[0],
                    preferred_element_type=jnp.float32) + bo[0]

    # ---------------- FeedForward (pre-norm, dropout = 0) ----------------
    h2 = _layernorm(x, ln2_g[0], ln2_b[0])
    f = jnp.dot(h2.astype(jnp.bfloat16), w1[0],
                preferred_element_type=jnp.float32) + b1[0]
    f = jax.nn.gelu(f, approximate=True)
    x = x + jnp.dot(f.astype(jnp.bfloat16), w2[0],
                    preferred_element_type=jnp.float32) + b2[0]

    x_scratch[...] = x

    @pl.when(lyr == n_layers - 1)
    def _finalize():
        o_ref[0] = _layernorm(x, norm_g[...], norm_b[...]).astype(o_ref.dtype)


# ---------------------------------------------------------------------------
# Small helper kernels: fc (Linear + GELU) and the classification head.
# ---------------------------------------------------------------------------
def fc_kernel(x_ref, w_ref, b_ref, o_ref):
    y = jnp.dot(x_ref[0].astype(jnp.bfloat16), w_ref[...],
                preferred_element_type=jnp.float32) + b_ref[...]
    o_ref[0] = jax.nn.gelu(y, approximate=True).astype(o_ref.dtype)


def head_kernel(x_ref, w_ref, b_ref, o_ref):
    o_ref[...] = (jnp.dot(x_ref[...].astype(jnp.bfloat16), w_ref[...],
                          preferred_element_type=jnp.float32)
                  + b_ref[...]).astype(o_ref.dtype)


# ---------------------------------------------------------------------------
# Host-side wrappers
# ---------------------------------------------------------------------------
_LAYER_NAMES = ('ln1_g', 'ln1_b', 'wq', 'bq', 'wk', 'bk', 'wv', 'bv',
                'wo', 'bo', 'emb_k', 'emb_v', 'ln2_g', 'ln2_b',
                'w1', 'b1', 'w2', 'b2')


def _transformer_dist(x, idx, params, heads):
    B, N, D = x.shape
    depth = params['wq'].shape[0]
    layer_ws = [params[n] for n in _LAYER_NAMES]

    def stacked(a):                 # per-layer weights: pick layer block via index_map
        nd = a.ndim
        return pl.BlockSpec((1,) + a.shape[1:],
                            lambda b, l, _nd=nd: (l,) + (0,) * (_nd - 1))

    def fixed(a):                   # final-norm params: resident
        nd = a.ndim
        return pl.BlockSpec(a.shape, lambda b, l, _nd=nd: (0,) * _nd)

    x_spec = pl.BlockSpec((1, N, D), lambda b, l: (b, 0, 0))
    idx_spec = pl.BlockSpec((1, N, N), lambda b, l: (b, 0, 0))

    return pl.pallas_call(
        functools.partial(transformer_kernel, heads),
        out_shape=jax.ShapeDtypeStruct((B, N, D), x.dtype),
        grid=(B, depth),
        in_specs=[x_spec, idx_spec] + [stacked(a) for a in layer_ws]
                 + [fixed(params['norm_g']), fixed(params['norm_b'])],
        out_specs=x_spec,
        scratch_shapes=[pltpu.VMEM((N, D), jnp.float32)],
        compiler_params=pltpu.CompilerParams(
            dimension_semantics=("parallel", "arbitrary")),
    )(x, idx, *layer_ws, params['norm_g'], params['norm_b'])


def transmil_dist_forward(x, coord, lens, params, *, heads, k):
    """TransMILDist.forward (pool='cls', dropout=0, mask disabled in the module)."""
    del lens  # unused: the mask branch is disabled (`and False`) and pool == 'cls'
    B, N0, in_dim = x.shape
    D = params['fc_w'].shape[1]
    C = params['head_w'].shape[1]

    # fc: Linear + GELU
    h = pl.pallas_call(
        fc_kernel,
        out_shape=jax.ShapeDtypeStruct((B, N0, D), jnp.float32),
        grid=(B,),
        in_specs=[pl.BlockSpec((1, N0, in_dim), lambda b: (b, 0, 0)),
                  pl.BlockSpec((in_dim, D), lambda b: (0, 0)),
                  pl.BlockSpec((1, D), lambda b: (0, 0))],
        out_specs=pl.BlockSpec((1, N0, D), lambda b: (b, 0, 0)),
        compiler_params=pltpu.CompilerParams(dimension_semantics=("parallel",)),
    )(x, params['fc_w'], params['fc_b'])

    # prepend cls token
    cls = jnp.broadcast_to(params['cls_token'][None, None, :], (B, 1, D))
    xt = jnp.concatenate([cls, h], axis=1)                      # (B, N0+1, D)

    # relation indices from coordinates (tiny int32 glue; cls token at coord 0)
    # TODO(synk): RelationAwareMultiHeadAttention source unavailable -> Shaw-style
    #             relation index = clip(round(pairwise distance), 0, k) assumed.
    coord_full = jnp.concatenate(
        [jnp.zeros((B, 1, 3), coord.dtype), coord], axis=1)
    diff = coord_full[:, :, None, :] - coord_full[:, None, :, :]
    dist = jnp.sqrt(jnp.sum(diff * diff, axis=-1))
    idx = jnp.clip(jnp.round(dist).astype(jnp.int32), 0, k)     # (B, N, N)

    xt = _transformer_dist(xt, idx, params, heads)

    pooled = xt[:, 0]                                           # pool == 'cls'

    logits = pl.pallas_call(
        head_kernel,
        out_shape=jax.ShapeDtypeStruct((B, C), jnp.float32),
        grid=(1,),
        in_specs=[pl.BlockSpec((B, D), lambda i: (0, 0)),
                  pl.BlockSpec((D, C), lambda i: (0, 0)),
                  pl.BlockSpec((1, C), lambda i: (0, 0))],
        out_specs=pl.BlockSpec((B, C), lambda i: (0, 0)),
    )(pooled, params['head_w'], params['head_b'])
    return logits


# ---------------------------------------------------------------------------
# Parameter initialization (matmul weights stored in bf16, accumulation in f32)
# ---------------------------------------------------------------------------
def init_params(key, *, num_classes, input_dim, dim, depth, heads, k, mlp_dim):
    dk = dim // heads
    ks = iter(jax.random.split(key, 32))
    f32 = jnp.float32

    def nrm(shape, dtype=jnp.bfloat16, scale=0.02):
        return (scale * jax.random.normal(next(ks), shape, f32)).astype(dtype)

    return {
        'cls_token': jax.random.normal(next(ks), (dim,), f32),
        'fc_w': nrm((input_dim, dim)), 'fc_b': nrm((1, dim), f32),
        'ln1_g': 1.0 + nrm((depth, 1, dim), f32, 0.05),
        'ln1_b': nrm((depth, 1, dim), f32, 0.05),
        'wq': nrm((depth, dim, dim)), 'bq': nrm((depth, 1, dim), f32),
        'wk': nrm((depth, dim, dim)), 'bk': nrm((depth, 1, dim), f32),
        'wv': nrm((depth, dim, dim)), 'bv': nrm((depth, 1, dim), f32),
        'wo': nrm((depth, dim, dim)), 'bo': nrm((depth, 1, dim), f32),
        'emb_k': nrm((depth, k + 1, dk)),
        'emb_v': nrm((depth, k + 1, dk)),
        'ln2_g': 1.0 + nrm((depth, 1, dim), f32, 0.05),
        'ln2_b': nrm((depth, 1, dim), f32, 0.05),
        'w1': nrm((depth, dim, mlp_dim)), 'b1': nrm((depth, 1, mlp_dim), f32),
        'w2': nrm((depth, mlp_dim, dim)), 'b2': nrm((depth, 1, dim), f32),
        'norm_g': jnp.ones((1, dim), f32),
        'norm_b': jnp.zeros((1, dim), f32),
        'head_w': nrm((dim, num_classes)), 'head_b': nrm((1, num_classes), f32),
    }


# ---------------------------------------------------------------------------
# Pure-JAX reference (same math / same mixed precision) for correctness checks
# ---------------------------------------------------------------------------
def reference_forward(x_in, coord, lens, params, *, heads):
    del lens
    f32, bf16 = jnp.float32, jnp.bfloat16
    B, N0, _ = x_in.shape
    D = params['fc_w'].shape[1]
    H = heads
    dk = D // H
    K1 = params['emb_k'].shape[1]
    depth = params['wq'].shape[0]
    scale = 1.0 / math.sqrt(dk)

    def ln(v, g, b, eps=1e-5):
        mu = jnp.mean(v, -1, keepdims=True)
        var = jnp.mean((v - mu) ** 2, -1, keepdims=True)
        return (v - mu) * jax.lax.rsqrt(var + eps) * g + b

    def mm(a, w):
        return jnp.einsum('...d,df->...f', a.astype(bf16), w,
                          preferred_element_type=f32)

    h = jax.nn.gelu(mm(x_in, params['fc_w']) + params['fc_b'], approximate=True)
    cls = jnp.broadcast_to(params['cls_token'][None, None, :], (B, 1, D))
    x = jnp.concatenate([cls, h], axis=1)
    N = N0 + 1

    coord_full = jnp.concatenate([jnp.zeros((B, 1, 3), coord.dtype), coord], axis=1)
    diff = coord_full[:, :, None, :] - coord_full[:, None, :, :]
    dist = jnp.sqrt(jnp.sum(diff * diff, axis=-1))
    idx = jnp.clip(jnp.round(dist).astype(jnp.int32), 0, K1 - 1)
    onehot = (idx[..., None] == jnp.arange(K1)[None, None, None, :]).astype(f32)

    for l in range(depth):
        hh = ln(x, params['ln1_g'][l], params['ln1_b'][l])
        q = mm(hh, params['wq'][l]) + params['bq'][l]
        k = mm(hh, params['wk'][l]) + params['bk'][l]
        v = mm(hh, params['wv'][l]) + params['bv'][l]
        q = q * scale
        qh = q.reshape(B, N, H, dk).transpose(0, 2, 1, 3).astype(bf16)
        kh = k.reshape(B, N, H, dk).transpose(0, 2, 1, 3).astype(bf16)
        vh = v.reshape(B, N, H, dk).transpose(0, 2, 1, 3).astype(bf16)
        scores = jnp.einsum('bhid,bhjd->bhij', qh, kh, preferred_element_type=f32)
        qe = jnp.einsum('bhid,rd->bhir', qh, params['emb_k'][l],
                        preferred_element_type=f32)
        scores = scores + jnp.einsum('bhir,bijr->bhij', qe, onehot)
        p = jax.nn.softmax(scores, axis=-1)
        ctx = jnp.einsum('bhij,bhjd->bhid', p.astype(bf16), vh,
                         preferred_element_type=f32)
        pb = jnp.einsum('bhij,bijr->bhir', p, onehot)
        ctx = ctx + jnp.einsum('bhir,rd->bhid', pb.astype(bf16),
                               params['emb_v'][l], preferred_element_type=f32)
        attn = ctx.transpose(0, 2, 1, 3).reshape(B, N, D)
        x = x + mm(attn, params['wo'][l]) + params['bo'][l]
        h2 = ln(x, params['ln2_g'][l], params['ln2_b'][l])
        f = jax.nn.gelu(mm(h2, params['w1'][l]) + params['b1'][l], approximate=True)
        x = x + mm(f, params['w2'][l]) + params['b2'][l]

    x = ln(x, params['norm_g'], params['norm_b'])
    pooled = x[:, 0]
    return mm(pooled, params['head_w']) + params['head_b']


# ---------------------------------------------------------------------------
if __name__ == "__main__":
    B, N0, IN_DIM = 2, 7, 48            # N0 patches -> N = 8 tokens with cls
    DIM, DEPTH, HEADS, K, MLP_DIM, NUM_CLASSES = 32, 2, 4, 10, 64, 3

    key = jax.random.PRNGKey(0)
    kx, kc, kp = jax.random.split(key, 3)
    x = jax.random.normal(kx, (B, N0, IN_DIM), jnp.float32)
    coord = 3.0 * jax.random.normal(kc, (B, N0, 3), jnp.float32)
    lens = jnp.full((B,), N0, jnp.int32)
    params = init_params(kp, num_classes=NUM_CLASSES, input_dim=IN_DIM, dim=DIM,
                         depth=DEPTH, heads=HEADS, k=K, mlp_dim=MLP_DIM)

    out = transmil_dist_forward(x, coord, lens, params, heads=HEADS, k=K)
    out = jax.block_until_ready(out)

    ref = reference_forward(x, coord, lens, params, heads=HEADS)
    assert out.shape == (B, NUM_CLASSES)
    err = float(jnp.max(jnp.abs(out - ref)))
    assert jnp.allclose(out, ref, atol=2e-3, rtol=2e-3), f"max abs err {err}"
    print("KERNEL_OK")
</pallas_src>

<mosaic_0001>
module attributes {stable_mosaic.version = 11 : i64} {
  func.func @fc_kernel(%arg0: i32, %arg1: memref<1x7x48xf32, #tpu.memory_space<vmem>>, %arg2: memref<48x32xbf16, #tpu.memory_space<vmem>>, %arg3: memref<1x32xf32, #tpu.memory_space<vmem>>, %arg4: memref<1x7x32xf32, #tpu.memory_space<vmem>>) attributes {dimension_semantics = [#tpu.dimension_semantics<parallel>], iteration_bounds = array<i64: 2>, scalar_prefetch = 0 : i64, scratch_operands = 0 : i64, tpu.core_type = #tpu.core_type<tc>, window_params = [{transform_indices = @transform_0, window_bounds = array<i64: 1, 7, 48>}, {pipeline_mode = #tpu.pipeline_mode<synchronous>, transform_indices = @transform_1, window_bounds = array<i64: 48, 32>}, {pipeline_mode = #tpu.pipeline_mode<synchronous>, transform_indices = @transform_2, window_bounds = array<i64: 1, 32>}, {transform_indices = @transform_3, window_bounds = array<i64: 1, 7, 32>}]} {
    %c0 = arith.constant 0 : index
    %c0_0 = arith.constant 0 : index
    %c0_1 = arith.constant 0 : index
    %0 = vector.load %arg1[%c0, %c0_0, %c0_1] : memref<1x7x48xf32, #tpu.memory_space<vmem>>, vector<1x7x48xf32>
    %1 = vector.shape_cast %0 : vector<1x7x48xf32> to vector<7x48xf32>
    %2 = arith.truncf %1 : vector<7x48xf32> to vector<7x48xbf16>
    %c0_2 = arith.constant 0 : index
    %c0_3 = arith.constant 0 : index
    %3 = vector.load %arg2[%c0_2, %c0_3] : memref<48x32xbf16, #tpu.memory_space<vmem>>, vector<48x32xbf16>
    %cst = arith.constant dense<0.000000e+00> : vector<7x32xf32>
    %4 = tpu.matmul %2, %3, %cst {dimension_numbers = #tpu.dot_dimension_numbers<[1], [0], [0], [1], [0, 0, 1, 1], [], []>} : vector<7x48xbf16>, vector<48x32xbf16>, vector<7x32xf32> -> vector<7x32xf32>
    %c0_4 = arith.constant 0 : index
    %c0_5 = arith.constant 0 : index
    %5 = vector.load %arg3[%c0_4, %c0_5] : memref<1x32xf32, #tpu.memory_space<vmem>>, vector<1x32xf32>
    %6 = vector.broadcast %5 : vector<1x32xf32> to vector<7x32xf32>
    %7 = arith.addf %4, %6 : vector<7x32xf32>
    %8 = arith.mulf %7, %7 : vector<7x32xf32>
    %9 = arith.mulf %7, %8 : vector<7x32xf32>
    %cst_6 = arith.constant 4.471500e-02 : f32
    %10 = vector.broadcast %cst_6 : f32 to vector<7x32xf32>
    %11 = arith.mulf %10, %9 : vector<7x32xf32>
    %12 = arith.addf %7, %11 : vector<7x32xf32>
    %cst_7 = arith.constant 0.797884583 : f32
    %13 = vector.broadcast %cst_7 : f32 to vector<7x32xf32>
    %14 = arith.mulf %13, %12 : vector<7x32xf32>
    %15 = math.tanh %14 : vector<7x32xf32>
    %cst_8 = arith.constant 1.000000e+00 : f32
    %16 = vector.broadcast %cst_8 : f32 to vector<7x32xf32>
    %17 = arith.addf %16, %15 : vector<7x32xf32>
    %cst_9 = arith.constant 5.000000e-01 : f32
    %18 = vector.broadcast %cst_9 : f32 to vector<7x32xf32>
    %19 = arith.mulf %18, %17 : vector<7x32xf32>
    %20 = arith.mulf %7, %19 : vector<7x32xf32>
    %c0_10 = arith.constant 0 : index
    %c0_11 = arith.constant 0 : index
    %c0_12 = arith.constant 0 : index
    %21 = vector.load %arg4[%c0_10, %c0_11, %c0_12] : memref<1x7x32xf32, #tpu.memory_space<vmem>>, vector<1x7x32xf32>
    %22 = vector.shape_cast %21 : vector<1x7x32xf32> to vector<7x32xf32>
    %23 = vector.shape_cast %20 : vector<7x32xf32> to vector<1x7x32xf32>
    tpu.vector_store %arg4[%c0_10, %c0_11, %c0_12], %23 {strides = array<i32>} : memref<1x7x32xf32, #tpu.memory_space<vmem>>, vector<1x7x32xf32>,
    return
  }
  func.func @transform_0(%arg0: i32) -> (i32, i32, i32) {
    %c0_i32 = arith.constant 0 : i32
    %c0_i32_0 = arith.constant 0 : i32
    %c0_i32_1 = arith.constant 0 : i32
    return %arg0, %c0_i32, %c0_i32_0 : i32, i32, i32
  }
  func.func @transform_1(%arg0: i32) -> (i32, i32) {
    %c0_i32 = arith.constant 0 : i32
    %c0_i32_0 = arith.constant 0 : i32
    %c0_i32_1 = arith.constant 0 : i32
    return %c0_i32, %c0_i32_0 : i32, i32
  }
  func.func @transform_2(%arg0: i32) -> (i32, i32) {
    %c0_i32 = arith.constant 0 : i32
    %c0_i32_0 = arith.constant 0 : i32
    %c0_i32_1 = arith.constant 0 : i32
    return %c0_i32, %c0_i32_0 : i32, i32
  }
  func.func @transform_3(%arg0: i32) -> (i32, i32, i32) {
    %c0_i32 = arith.constant 0 : i32
    %c0_i32_0 = arith.constant 0 : i32
    %c0_i32_1 = arith.constant 0 : i32
    return %arg0, %c0_i32, %c0_i32_0 : i32, i32, i32
  }
}

</mosaic_0001>

<bundles_post_ra>
// kernel: tpu_custom_call.1
= control target key start
LH: loop header
LB: loop body
LE: loop exit
PB: predicated region body
PF: predicated region fallthrough
CT: control target
= control target key end

     0   :  { %s381_s12 = smov 0   ;;  %s410_s0 = inlined_call_operand.vmem [shape: f32[2,7,48], index: 0, kind: input, shape index: {}]   ;;  %s411_s1 = inlined_call_operand.vmem [shape: bf16[48,32], index: 1, kind: input, shape index: {}]   ;;  %s412_s2 = inlined_call_operand.vmem [shape: f32[1,32], index: 2, kind: input, shape index: {}]   ;;  %s413_s3 = inlined_call_operand.vmem [shape: f32[2,7,32], index: 3, kind: output, shape index: {}]  }
   0x1 LB: > { %s308_s13 = sadd.s32 4294967295, %s357_s12   ;;  %p312_p0 = scmp.ge.s32.totalorder %s357_s12, 1  ;;  %s357_s12 = sphi %s381_s12, %s13_s12  }
   0x2   : > { %p136_p1 = scmp.lt.s32.totalorder %s357_s12, 3 }
   0x4   : > { %p137_p2 = pnand %p312_p0, %p136_p1 }
   0x5   : > { %v346_v0 = vld [vmem:[%s411_s1] sm:$0xff] (!%p137_p2)   ;;  %v359_v1 = vmov (!%p137_p2), 0.0   ;;  %v347_v2 = vld [vmem:[%s411_s1 + $0x8] sm:$0xff] (!%p137_p2)   ;;  %vm360_vm0 = vmmov (!%p137_p2), 0   ;;  %p158_p3 = scmp.lt.s32.totalorder (!%p137_p2), %s308_s13, 1  ;;  %v348_v3 = vld [vmem:[%s411_s1 + $0x10] sm:$0xff] (!%p137_p2)  }
   0x6   : > { %140 = sbr.rel (%p137_p2) target bundleno = 261 (0x105), region = 32  ;;  %326 = vmatprep.subr.bf16.mxu0 (!%p137_p2), %v359_v1  ;;  %332 = vmatprep.mubr.msk.bf16.mxu0 (!%p137_p2), %vm360_vm0, %v359_v1  ;;  %vm200_vm1 = vcmask (!%p137_p2), 392192   ;;  %v315_v6 = vld [vmem:[%s412_s2] ss:$0 sm:$0xff] (!%p137_p2)  ;;  %vm253_vm2 = vcmask (!%p137_p2), 260096  }
   0x7   : > { %327 = vmatpush3.bf16.msra.mxu0 (!%p137_p2), %v346_v0 }
   0x8   : > { %328 = vmatprep.subr.bf16.mxu0 (!%p137_p2), %v359_v1 }
   0xb   : > { %329 = vmatpush3.bf16.msra.mxu0 (!%p137_p2), %v347_v2 }
   0xc   : > { %330 = vmatprep.subr.bf16.mxu0 (!%p137_p2), %v359_v1 }
   0xd   : > { %s415_s13 = smov (!%p158_p3, %s308_s13), 1 }
   0xe   : > { %s313_s20 = sshll.u32 %s415_s13, 3 }
   0xf   : > { %s161_s23 = scalar_lea.vmem %s410_s0, %s313_s20  ;;  %331 = vmatpush3.bf16.msra.mxu0 %v348_v3  ;;  %s165_s28 = scalar_lea.vmem %s413_s3, %s313_s20 }
  0x10   : > { %v167_v4 = vld [vmem:[%s161_s23] sm:$0x7f] }
  0x11   : > { %v168_v5 = vpack.c.bf16 %v167_v4, %v167_v4 }
  0x13   : > { %333 = vmatmul.mubr.msk.bf16.vlgmr.msra.gmra.mrb[0].mxu0 %vm200_vm1, %v168_v5 }
  0xe6   : > { %v238_v7 = vpop.f32.mrb[0].mxu0 }
  0xe7   : > { %v239_v8 = vadd.f32 %v315_v6, %v238_v7  ;;  %v334_v9 = vpop.f32.mrb[1].mxu0 }
  0xe8   : > { %v241_v10 = vpop.f32.mrb[2].mxu0 }
  0xe9   : > { %v244_v11 = vmul.f32 %v239_v8, %v239_v8  ;;  %v335_v12 = vpop.f32.mrb[3].mxu0 }
  0xeb   : > { %v245_v13 = vmul.f32 %v244_v11, %v239_v8 }
  0xed   : > { %v246_v14 = vmul.f32 0.044715, %v245_v13 }
  0xef   : > { %v247_v15 = vadd.f32 %v246_v14, %v239_v8 }
  0xf1   : > { %v248_v16 = vmul.f32 0.7978846, %v247_v15 }
  0xf3   : > { %349 = vtanh.f32 %v248_v16 }
  0xfd   : > { %v350_v17 = vpop.eup %349 }
  0xfe   : > { %v250_v18 = vadd.f32 1.0, %v350_v17 }
 0x100   : > { %v251_v19 = vmul.f32 0.5, %v250_v18 }
 0x102   : > { %v252_v20 = vmul.f32 %v251_v19, %v239_v8 }
 0x104   : > { %254 = vst.msk [vmem:[%s165_s28] sm:$0x7f] %vm253_vm2, %v252_v20 }
 0x105 PF: > { %s13_s12 = sadd.s32 1, %s357_s12  }
 0x106   : > { %p10_p4 = scmp.ge.s32.totalorder %s13_s12, 4  }
 0x108   :  { %12 = sbr.rel (!%p10_p4) target bundleno = 1 (0x1), region = 62 }

</bundles_post_ra>
